<compile_context>
chip_gen: v7x
topology: tpu7x:2x2x1
jax: 0.10.0
libtpu: 0.0.40
codegen_flags: <defaults>
</compile_context>

<pallas_src>
import math

import jax
import jax.numpy as jnp
from jax import lax
from jax.experimental import pallas as pl
from jax.experimental.pallas import tpu as pltpu


def _gate_kernel(h_ref, wt_ref, o_ref):
    # h_ref: (TM, D) tokens, wt_ref: (D, E) pre-transposed weights,
    # o_ref: (TM, E) probabilities.
    logits = lax.dot_general(
        h_ref[...],
        wt_ref[...],
        dimension_numbers=(((1,), (0,)), ((), ())),   # (M,K) x (K,N) -> no relayout
        preferred_element_type=jnp.float32,
    )  # (TM, E), f32 accumulation

    m = jnp.max(logits, axis=-1, keepdims=True)
    e = jnp.exp(logits - m)
    denom = jnp.sum(e, axis=-1, keepdims=True)
    # Exact reciprocal: preserves sum-to-1 at tight tolerance, and the kernel
    # is DMA-bound so the EUP approx buys nothing.
    probs = e * pl.reciprocal(denom, approx=False)
    o_ref[...] = probs.astype(o_ref.dtype)


def _vmem_capacity_bytes() -> int:
    try:
        return int(pltpu.get_tpu_info().vmem_capacity_bytes)
    except Exception:
        return 64 << 20  # conservative (v7x per-TC)


def _choose_tm(m: int, d_input: int, itemsize: int, vmem_cap: int) -> tuple[int, int]:
    """Largest token tile such that two double-buffered h tiles stay well
    inside VMEM on every generation.  Returns (tm, sublane_multiple)."""
    # dtype-specific sublane packing: 8 rows f32, 16 bf16, 32 int8/fp8.
    sub = 8 * max(1, 4 // itemsize)
    # ~22% of VMEM per h buffer -> ~14 MiB on v7x (64 MiB), ~28 MiB on v5e/v6e.
    per_buffer_budget = max(sub * d_input * itemsize, int(vmem_cap * 0.22))
    tm = per_buffer_budget // max(1, d_input * itemsize)
    m_rounded = pl.cdiv(m, sub) * sub
    tm = min(tm, m_rounded, 8192)
    tm = max(sub, (tm // sub) * sub)
    return tm, sub


def gate_forward(h: jax.Array, w: jax.Array) -> jax.Array:
    """h: (..., d_input), w: (n_expert, d_input) -> (..., n_expert)."""
    *lead, d_input = h.shape
    n_expert = w.shape[0]
    m = math.prod(lead) if lead else 1
    h2 = h.reshape(m, d_input)
    w_t = jnp.transpose(w)  # (d_input, n_expert): one tiny XLA transpose, hoisted

    itemsize = jnp.dtype(h.dtype).itemsize
    vmem_cap = _vmem_capacity_bytes()
    tm, _sub = _choose_tm(m, d_input, itemsize, vmem_cap)

    # No padding: partial last block is handled by Pallas (masked write); the
    # tail rows' softmax garbage is never committed to HBM.
    grid = (pl.cdiv(m, tm),)

    # Size the scoped-VMEM limit from actual usage (double-buffered tiles),
    # keeping headroom for Mosaic internal scratch on v7x's 64 MiB/TC.
    h_tile_bytes = tm * d_input * itemsize
    w_bytes = d_input * n_expert * itemsize
    out_tile_bytes = tm * n_expert * itemsize
    needed = 2 * h_tile_bytes + 2 * w_bytes + 2 * out_tile_bytes
    vmem_limit = int(min(vmem_cap - (8 << 20), needed + (16 << 20)))
    vmem_limit = max(vmem_limit, 16 << 20)

    cost = pl.CostEstimate(
        flops=2 * m * d_input * n_expert,
        transcendentals=m * n_expert,
        bytes_accessed=(
            m * d_input * itemsize
            + n_expert * d_input * itemsize
            + m * n_expert * itemsize
        ),
    )

    out = pl.pallas_call(
        _gate_kernel,
        out_shape=jax.ShapeDtypeStruct((m, n_expert), h.dtype),
        grid=grid,
        in_specs=[
            pl.BlockSpec((tm, d_input), lambda i: (i, 0)),            # token tile
            pl.BlockSpec((d_input, n_expert), lambda i: (0, 0)),      # resident W^T
        ],
        out_specs=pl.BlockSpec((tm, n_expert), lambda i: (i, 0)),
        compiler_params=pltpu.CompilerParams(
            dimension_semantics=("parallel",),
            vmem_limit_bytes=vmem_limit,
        ),
        cost_estimate=cost,
    )(h2, w_t)

    return out.reshape(*lead, n_expert)


if __name__ == "__main__":
    batch, seq, d_input, n_expert = 2, 8, 32, 4

    key = jax.random.PRNGKey(0)
    k_h, k_w = jax.random.split(key)

    h = jax.random.normal(k_h, (batch, seq, d_input), dtype=jnp.float32)
    # Deterministic init mimicking nn.Linear default (uniform in +/- 1/sqrt(d_input)).
    bound = 1.0 / (d_input ** 0.5)
    w = jax.random.uniform(
        k_w, (n_expert, d_input), dtype=jnp.float32, minval=-bound, maxval=bound
    )

    out = gate_forward(h, w)
    out = jax.block_until_ready(out)

    # Reference check (plain JAX).
    ref = jax.nn.softmax(h @ w.T, axis=-1)
    assert out.shape == (batch, seq, n_expert)
    assert jnp.allclose(out, ref, atol=1e-5, rtol=1e-5)
    assert jnp.allclose(jnp.sum(out, axis=-1), 1.0, atol=1e-5)

    print("KERNEL_OK")
</pallas_src>

<mosaic_0001>
module attributes {stable_mosaic.version = 11 : i64} {
  func.func @_gate_kernel(%arg0: i32, %arg1: memref<16x32xf32, #tpu.memory_space<vmem>>, %arg2: memref<32x4xf32, #tpu.memory_space<vmem>>, %arg3: memref<16x4xf32, #tpu.memory_space<vmem>>) attributes {dimension_semantics = [#tpu.dimension_semantics<parallel>], iteration_bounds = array<i64: 1>, scalar_prefetch = 0 : i64, scratch_operands = 0 : i64, tpu.core_type = #tpu.core_type<tc>, window_params = [{transform_indices = @transform_0, window_bounds = array<i64: 16, 32>}, {pipeline_mode = #tpu.pipeline_mode<synchronous>, transform_indices = @transform_1, window_bounds = array<i64: 32, 4>}, {transform_indices = @transform_2, window_bounds = array<i64: 16, 4>}]} {
    %c0 = arith.constant 0 : index
    %c0_0 = arith.constant 0 : index
    %0 = vector.load %arg1[%c0, %c0_0] : memref<16x32xf32, #tpu.memory_space<vmem>>, vector<16x32xf32>
    %c0_1 = arith.constant 0 : index
    %c0_2 = arith.constant 0 : index
    %1 = vector.load %arg2[%c0_1, %c0_2] : memref<32x4xf32, #tpu.memory_space<vmem>>, vector<32x4xf32>
    %cst = arith.constant dense<0.000000e+00> : vector<16x4xf32>
    %2 = tpu.matmul %0, %1, %cst {dimension_numbers = #tpu.dot_dimension_numbers<[1], [0], [0], [1], [0, 0, 1, 1], [], []>} : vector<16x32xf32>, vector<32x4xf32>, vector<16x4xf32> -> vector<16x4xf32>
    %cst_3 = arith.constant dense<0xFF800000> : vector<16xf32>
    %3 = vector.multi_reduction <maximumf>, %2, %cst_3 [1] : vector<16x4xf32> to vector<16xf32>
    %4 = vector.shape_cast %3 : vector<16xf32> to vector<16x1xf32>
    %5 = vector.broadcast %4 : vector<16x1xf32> to vector<16x4xf32>
    %6 = arith.subf %2, %5 : vector<16x4xf32>
    %7 = math.exp %6 : vector<16x4xf32>
    %cst_4 = arith.constant dense<0.000000e+00> : vector<16xf32>
    %8 = vector.multi_reduction <add>, %7, %cst_4 [1] : vector<16x4xf32> to vector<16xf32>
    %9 = vector.shape_cast %8 : vector<16xf32> to vector<16x1xf32>
    %10 = tpu.reciprocal %9 : vector<16x1xf32> -> vector<16x1xf32>
    %11 = vector.broadcast %10 : vector<16x1xf32> to vector<16x4xf32>
    %12 = arith.mulf %7, %11 : vector<16x4xf32>
    %c0_5 = arith.constant 0 : index
    %c0_6 = arith.constant 0 : index
    %13 = vector.load %arg3[%c0_5, %c0_6] : memref<16x4xf32, #tpu.memory_space<vmem>>, vector<16x4xf32>
    tpu.vector_store %arg3[%c0_5, %c0_6], %12 {strides = array<i32>} : memref<16x4xf32, #tpu.memory_space<vmem>>, vector<16x4xf32>,
    return
  }
  func.func @transform_0(%arg0: i32) -> (i32, i32) {
    %c0_i32 = arith.constant 0 : i32
    %c0_i32_0 = arith.constant 0 : i32
    return %arg0, %c0_i32 : i32, i32
  }
  func.func @transform_1(%arg0: i32) -> (i32, i32) {
    %c0_i32 = arith.constant 0 : i32
    %c0_i32_0 = arith.constant 0 : i32
    %c0_i32_1 = arith.constant 0 : i32
    return %c0_i32, %c0_i32_0 : i32, i32
  }
  func.func @transform_2(%arg0: i32) -> (i32, i32) {
    %c0_i32 = arith.constant 0 : i32
    %c0_i32_0 = arith.constant 0 : i32
    return %arg0, %c0_i32 : i32, i32
  }
}

</mosaic_0001>

<bundles_post_ra>
// kernel: tpu_custom_call.1
= control target key start
LH: loop header
LB: loop body
LE: loop exit
PB: predicated region body
PF: predicated region fallthrough
CT: control target
= control target key end

     0   :  { %vm17_vm0 = vcmask 261120   ;;  %vm99_vm1 = vcmask 31744   ;;  %s208_s1 = inlined_call_operand.vmem [shape: f32[32,4], index: 1, kind: input, shape index: {}]   ;;  %s209_s0 = inlined_call_operand.vmem [shape: f32[16,32], index: 0, kind: input, shape index: {}]   ;;  %s210_s2 = inlined_call_operand.vmem [shape: f32[16,4], index: 2, kind: output, shape index: {}]  }
   0x1   :  { %v13_v0 = vld [vmem:[%s208_s1] sm:$0xff]  ;;  %v14_v1 = vld [vmem:[%s208_s1 + $0x8] sm:$0xff]  ;;  %v15_v2 = vld [vmem:[%s208_s1 + $0x10] sm:$0xff] }
   0x2   :  { %v147_v3 = vpack.c.bf16 %v14_v1, %v13_v0  ;;  %v16_v4 = vld [vmem:[%s208_s1 + $0x18] sm:$0xff]  ;;  %v11_v5 = vld [vmem:[%s209_s0] sm:$0xff]  ;;  %v12_v7 = vld [vmem:[%s209_s0 + $0x8] sm:$0xff] }
   0x3   :  { %v151_v6 = vpack.c.bf16 %v16_v4, %v15_v2  ;;  %144 = vmatprep.mubr.msk.f32.mxu0 %vm17_vm0, %v11_v5 }
   0x4   :  { %148 = vmatprep.subr.bf16.mxu0 %v147_v3 }
   0x5   :  { %150 = vmatpush3.bf16.msra.mxu0 %v147_v3 }
   0x6   :  { %152 = vmatprep.subr.bf16.mxu0 %v151_v6 }
   0x9   :  { %154 = vmatpush3.bf16.msra.mxu0 %v151_v6 }
   0xc   :  { %145 = vmatmul.mubr.msk.f32.vlgmr.msra.gmra.mrb[0].mxu0 %vm17_vm0, %v12_v7 }
  0xdf   :  { %v146_v8 = vpop.f32.mrb[0].mxu0 }
  0xe0   :  { %v90_v9 = vpop.f32.mrb[1].mxu0  ;;  %v103_v11 = vsel %vm99_vm1, %v146_v8, -inf }
  0xe1   :  { %v100_v10 = vsel %vm99_vm1, %v90_v9, -inf }
  0xe2   :  { %101 = vmax.xlane.f32.xlu0 %v100_v10 }
  0xe6   :  { %104 = vmax.xlane.f32.xlu0 %v103_v11 }
 0x16f   :  { %v102_v12 = vpop.xlane.xlu0 %101 }
 0x170   :  { %v106_v13 = vsub.f32 %v90_v9, %v102_v12 }
 0x172   :  { %v108_v14 = vmul.f32 1.442695, %v106_v13 }
 0x173   :  { %v105_v15 = vpop.xlane.xlu0 %104 }
 0x174   :  { %155 = vpow2.f32 %v108_v14  ;;  %v107_v16 = vsub.f32 %v146_v8, %v105_v15 }
 0x176   :  { %v110_v17 = vmul.f32 1.442695, %v107_v16 }
 0x178   :  { %157 = vpow2.f32 %v110_v17 }
 0x17e   :  { %v156_v18 = vpop.eup %155 }
 0x17f   :  { %v112_v19 = vsel %vm99_vm1, %v156_v18, 0.0 }
 0x180   :  { %113 = vadd.xlane.f32.xlu1 %v112_v19 }
 0x182   :  { %v158_v20 = vpop.eup %157 }
 0x183   :  { %v115_v21 = vsel %vm99_vm1, %v158_v20, 0.0 }
 0x184   :  { %116 = vadd.xlane.f32.xlu1 %v115_v21 }
 0x20d   :  { %v114_v22 = vpop.xlane.xlu1 %113 }
 0x20e   :  { %159 = vrcp.f32 %v114_v22 }
 0x211   :  { %v117_v23 = vpop.xlane.xlu1 %116 }
 0x212   :  { %161 = vrcp.f32 %v117_v23 }
 0x218   :  { %v160_v24 = vpop.eup %159 }
 0x219   :  { %v120_v25 = vmul.f32 %v160_v24, %v156_v18 }
 0x21b   :  { %122 = vst.msk [vmem:[%s210_s2] sm:$0xff] %vm99_vm1, %v120_v25 }
 0x21c   :  { %v162_v26 = vpop.eup %161 }
 0x21d   :  { %v121_v27 = vmul.f32 %v162_v26, %v158_v20 }
 0x21f   :  { %123 = vst.msk [vmem:[%s210_s2 + $0x8] sm:$0xff] %vm99_vm1, %v121_v27 }

</bundles_post_ra>
